<compile_context>
chip_gen: v6e
topology: v6e:2x2x1
jax: 0.10.0
libtpu: 0.0.40
codegen_flags: <defaults>
</compile_context>

<pallas_src>
import jax
import jax.numpy as jnp
from jax.experimental import pallas as pl
from jax.experimental.pallas import tpu as pltpu


def _skipnet_kernel(x_idx_ref, y_idx_ref,      # scalar prefetch (SMEM): (B,) int32 each
                    center_hbm, out_hbm,       # HBM refs: (V, D) f32 each
                    partial_ref,               # output block: (1, 1, 1) f32
                    cbuf, obuf, sems):         # scratch: (Bt, D) f32 x2, DMA sems (2, Bt)
    bt = cbuf.shape[0]
    base = pl.program_id(0) * bt

    # Gather the Bt needed rows of each embedding table straight from HBM
    # into VMEM (async, all copies in flight before waiting).
    copies = []
    for j in range(bt):
        cx = pltpu.make_async_copy(center_hbm.at[pl.ds(x_idx_ref[base + j], 1)],
                                   cbuf.at[pl.ds(j, 1)], sems.at[0, j])
        cy = pltpu.make_async_copy(out_hbm.at[pl.ds(y_idx_ref[base + j], 1)],
                                   obuf.at[pl.ds(j, 1)], sems.at[1, j])
        cx.start()
        cy.start()
        copies.append(cx)
        copies.append(cy)
    for cp in copies:
        cp.wait()

    ec = cbuf[...]                                            # (Bt, D) f32
    eo = obuf[...]                                            # (Bt, D) f32
    dots = jnp.sum(ec * eo, axis=-1, keepdims=True)           # (Bt, 1)

    # Numerically stable log-sigmoid: min(z, 0) - log(1 + exp(-|z|))
    ls = jnp.minimum(dots, 0.0) - jnp.log(1.0 + jnp.exp(-jnp.abs(dots)))

    # Per-tile partial sum of log-sigmoid values.
    partial_ref[0] = jnp.sum(ls, axis=0, keepdims=True)       # (1, 1)


def skipnet_forward(center_weight, out_weight, x, y, *, batch_tiles=2):
    """Returns -mean(logsigmoid(sum(center_weight[x] * out_weight[y], axis=1)))."""
    B = x.shape[0]
    V, D = center_weight.shape
    assert B % batch_tiles == 0, "batch must divide evenly into tiles"
    bt = B // batch_tiles

    partials = pl.pallas_call(
        _skipnet_kernel,
        out_shape=jax.ShapeDtypeStruct((batch_tiles, 1, 1), jnp.float32),
        grid_spec=pltpu.PrefetchScalarGridSpec(
            num_scalar_prefetch=2,
            grid=(batch_tiles,),
            in_specs=[pl.BlockSpec(memory_space=pl.ANY),      # center table stays in HBM
                      pl.BlockSpec(memory_space=pl.ANY)],     # out table stays in HBM
            out_specs=pl.BlockSpec((1, 1, 1), lambda i, xr, yr: (i, 0, 0)),
            scratch_shapes=[pltpu.VMEM((bt, D), jnp.float32),
                            pltpu.VMEM((bt, D), jnp.float32),
                            pltpu.SemaphoreType.DMA((2, bt))]),
        compiler_params=pltpu.CompilerParams(
            dimension_semantics=("parallel",)),
    )(x.astype(jnp.int32), y.astype(jnp.int32), center_weight, out_weight)

    # Finalize: tiny (batch_tiles,) reduce + scale + negate (negligible XLA glue).
    return -(jnp.sum(partials) / B)


def init_params(key, vocab_size, embedding_dim):
    # matches nn.Embedding(...).weight.data.uniform_(-1, 1)
    kc, ko = jax.random.split(key)
    center_w = jax.random.uniform(kc, (vocab_size, embedding_dim), jnp.float32, -1.0, 1.0)
    out_w = jax.random.uniform(ko, (vocab_size, embedding_dim), jnp.float32, -1.0, 1.0)
    return center_w, out_w


if __name__ == "__main__":
    B, VOCAB, DIM = 8, 32, 128

    key = jax.random.PRNGKey(0)
    kp, kx, ky = jax.random.split(key, 3)
    center_w, out_w = init_params(kp, VOCAB, DIM)
    x = jax.random.randint(kx, (B,), 0, VOCAB, dtype=jnp.int32)   # center word ids
    y = jax.random.randint(ky, (B,), 0, VOCAB, dtype=jnp.int32)   # context word ids

    loss = skipnet_forward(center_w, out_w, x, y)
    jax.block_until_ready(loss)

    # pure-JAX reference check of the forward semantics
    ref = -jnp.mean(jax.nn.log_sigmoid(jnp.sum(center_w[x] * out_w[y], axis=1)))
    assert loss.shape == () and loss.dtype == jnp.float32
    assert jnp.allclose(loss, ref, rtol=1e-4, atol=1e-4), (loss, ref)
    print("KERNEL_OK")
</pallas_src>

<mosaic_0001>
module attributes {stable_mosaic.version = 11 : i64} {
  func.func @_skipnet_kernel(%arg0: i32, %arg1: memref<8xi32, #tpu.memory_space<smem>>, %arg2: memref<8xi32, #tpu.memory_space<smem>>, %arg3: memref<32x128xf32, #tpu.memory_space<any>>, %arg4: memref<32x128xf32, #tpu.memory_space<any>>, %arg5: memref<1x1x1xf32, #tpu.memory_space<vmem>>, %arg6: memref<4x128xf32, #tpu.memory_space<vmem>>, %arg7: memref<4x128xf32, #tpu.memory_space<vmem>>, %arg8: memref<2x4x!tpu.dma_semaphore, #tpu.memory_space<semaphore_mem>>) attributes {dimension_semantics = [#tpu.dimension_semantics<parallel>], iteration_bounds = array<i64: 2>, scalar_prefetch = 2 : i64, scratch_operands = 3 : i64, tpu.core_type = #tpu.core_type<tc>, window_params = [{}, {}, {transform_indices = @transform_2, window_bounds = array<i64: 1, 1, 1>}]} {
    %c4_i32 = arith.constant 4 : i32
    %0 = arith.muli %arg0, %c4_i32 : i32
    %c0_i32 = arith.constant 0 : i32
    %1 = arith.addi %0, %c0_i32 : i32
    %2 = arith.index_cast %1 : i32 to index
    %3 = memref.load %arg1[%2] : memref<8xi32, #tpu.memory_space<smem>>
    %c0_i32_0 = arith.constant 0 : i32
    %4 = arith.addi %0, %c0_i32_0 : i32
    %5 = arith.index_cast %4 : i32 to index
    %6 = memref.load %arg2[%5] : memref<8xi32, #tpu.memory_space<smem>>
    %c0_i32_1 = arith.constant 0 : i32
    %c0_i32_2 = arith.constant 0 : i32
    %c0_i32_3 = arith.constant 0 : i32
    %7 = tpu.memref_slice %arg3[%3, %c0_i32_3] : memref<32x128xf32, #tpu.memory_space<any>> -> memref<1x128xf32, #tpu.memory_space<any>>
    %c0_i32_4 = arith.constant 0 : i32
    %c0_i32_5 = arith.constant 0 : i32
    %8 = tpu.memref_slice %arg6[%c0_i32_4, %c0_i32_5] : memref<4x128xf32, #tpu.memory_space<vmem>> -> memref<1x128xf32, #tpu.memory_space<vmem>>
    %9 = tpu.memref_slice %arg8[%c0_i32_1, %c0_i32_2] : memref<2x4x!tpu.dma_semaphore, #tpu.memory_space<semaphore_mem>> -> memref<1x1x!tpu.dma_semaphore, #tpu.memory_space<semaphore_mem>>
    %10 = tpu.memref_squeeze %9 : memref<1x1x!tpu.dma_semaphore, #tpu.memory_space<semaphore_mem>> -> memref<!tpu.dma_semaphore, #tpu.memory_space<semaphore_mem>>
    tpu.enqueue_dma source(%7 : memref<1x128xf32, #tpu.memory_space<any>>) target(%8 : memref<1x128xf32, #tpu.memory_space<vmem>>) target_semaphore(%10 : memref<!tpu.dma_semaphore, #tpu.memory_space<semaphore_mem>>)
    %c1_i32 = arith.constant 1 : i32
    %c0_i32_6 = arith.constant 0 : i32
    %c0_i32_7 = arith.constant 0 : i32
    %11 = tpu.memref_slice %arg4[%6, %c0_i32_7] : memref<32x128xf32, #tpu.memory_space<any>> -> memref<1x128xf32, #tpu.memory_space<any>>
    %c0_i32_8 = arith.constant 0 : i32
    %c0_i32_9 = arith.constant 0 : i32
    %12 = tpu.memref_slice %arg7[%c0_i32_8, %c0_i32_9] : memref<4x128xf32, #tpu.memory_space<vmem>> -> memref<1x128xf32, #tpu.memory_space<vmem>>
    %13 = tpu.memref_slice %arg8[%c1_i32, %c0_i32_6] : memref<2x4x!tpu.dma_semaphore, #tpu.memory_space<semaphore_mem>> -> memref<1x1x!tpu.dma_semaphore, #tpu.memory_space<semaphore_mem>>
    %14 = tpu.memref_squeeze %13 : memref<1x1x!tpu.dma_semaphore, #tpu.memory_space<semaphore_mem>> -> memref<!tpu.dma_semaphore, #tpu.memory_space<semaphore_mem>>
    tpu.enqueue_dma source(%11 : memref<1x128xf32, #tpu.memory_space<any>>) target(%12 : memref<1x128xf32, #tpu.memory_space<vmem>>) target_semaphore(%14 : memref<!tpu.dma_semaphore, #tpu.memory_space<semaphore_mem>>)
    %c1_i32_10 = arith.constant 1 : i32
    %15 = arith.addi %0, %c1_i32_10 : i32
    %16 = arith.index_cast %15 : i32 to index
    %17 = memref.load %arg1[%16] : memref<8xi32, #tpu.memory_space<smem>>
    %c1_i32_11 = arith.constant 1 : i32
    %18 = arith.addi %0, %c1_i32_11 : i32
    %19 = arith.index_cast %18 : i32 to index
    %20 = memref.load %arg2[%19] : memref<8xi32, #tpu.memory_space<smem>>
    %c0_i32_12 = arith.constant 0 : i32
    %c1_i32_13 = arith.constant 1 : i32
    %c0_i32_14 = arith.constant 0 : i32
    %21 = tpu.memref_slice %arg3[%17, %c0_i32_14] : memref<32x128xf32, #tpu.memory_space<any>> -> memref<1x128xf32, #tpu.memory_space<any>>
    %c1_i32_15 = arith.constant 1 : i32
    %c0_i32_16 = arith.constant 0 : i32
    %22 = tpu.memref_slice %arg6[%c1_i32_15, %c0_i32_16] : memref<4x128xf32, #tpu.memory_space<vmem>> -> memref<1x128xf32, #tpu.memory_space<vmem>>
    %23 = tpu.memref_slice %arg8[%c0_i32_12, %c1_i32_13] : memref<2x4x!tpu.dma_semaphore, #tpu.memory_space<semaphore_mem>> -> memref<1x1x!tpu.dma_semaphore, #tpu.memory_space<semaphore_mem>>
    %24 = tpu.memref_squeeze %23 : memref<1x1x!tpu.dma_semaphore, #tpu.memory_space<semaphore_mem>> -> memref<!tpu.dma_semaphore, #tpu.memory_space<semaphore_mem>>
    tpu.enqueue_dma source(%21 : memref<1x128xf32, #tpu.memory_space<any>>) target(%22 : memref<1x128xf32, #tpu.memory_space<vmem>>) target_semaphore(%24 : memref<!tpu.dma_semaphore, #tpu.memory_space<semaphore_mem>>)
    %c1_i32_17 = arith.constant 1 : i32
    %c1_i32_18 = arith.constant 1 : i32
    %c0_i32_19 = arith.constant 0 : i32
    %25 = tpu.memref_slice %arg4[%20, %c0_i32_19] : memref<32x128xf32, #tpu.memory_space<any>> -> memref<1x128xf32, #tpu.memory_space<any>>
    %c1_i32_20 = arith.constant 1 : i32
    %c0_i32_21 = arith.constant 0 : i32
    %26 = tpu.memref_slice %arg7[%c1_i32_20, %c0_i32_21] : memref<4x128xf32, #tpu.memory_space<vmem>> -> memref<1x128xf32, #tpu.memory_space<vmem>>
    %27 = tpu.memref_slice %arg8[%c1_i32_17, %c1_i32_18] : memref<2x4x!tpu.dma_semaphore, #tpu.memory_space<semaphore_mem>> -> memref<1x1x!tpu.dma_semaphore, #tpu.memory_space<semaphore_mem>>
    %28 = tpu.memref_squeeze %27 : memref<1x1x!tpu.dma_semaphore, #tpu.memory_space<semaphore_mem>> -> memref<!tpu.dma_semaphore, #tpu.memory_space<semaphore_mem>>
    tpu.enqueue_dma source(%25 : memref<1x128xf32, #tpu.memory_space<any>>) target(%26 : memref<1x128xf32, #tpu.memory_space<vmem>>) target_semaphore(%28 : memref<!tpu.dma_semaphore, #tpu.memory_space<semaphore_mem>>)
    %c2_i32 = arith.constant 2 : i32
    %29 = arith.addi %0, %c2_i32 : i32
    %30 = arith.index_cast %29 : i32 to index
    %31 = memref.load %arg1[%30] : memref<8xi32, #tpu.memory_space<smem>>
    %c2_i32_22 = arith.constant 2 : i32
    %32 = arith.addi %0, %c2_i32_22 : i32
    %33 = arith.index_cast %32 : i32 to index
    %34 = memref.load %arg2[%33] : memref<8xi32, #tpu.memory_space<smem>>
    %c0_i32_23 = arith.constant 0 : i32
    %c2_i32_24 = arith.constant 2 : i32
    %c0_i32_25 = arith.constant 0 : i32
    %35 = tpu.memref_slice %arg3[%31, %c0_i32_25] : memref<32x128xf32, #tpu.memory_space<any>> -> memref<1x128xf32, #tpu.memory_space<any>>
    %c2_i32_26 = arith.constant 2 : i32
    %c0_i32_27 = arith.constant 0 : i32
    %36 = tpu.memref_slice %arg6[%c2_i32_26, %c0_i32_27] : memref<4x128xf32, #tpu.memory_space<vmem>> -> memref<1x128xf32, #tpu.memory_space<vmem>>
    %37 = tpu.memref_slice %arg8[%c0_i32_23, %c2_i32_24] : memref<2x4x!tpu.dma_semaphore, #tpu.memory_space<semaphore_mem>> -> memref<1x1x!tpu.dma_semaphore, #tpu.memory_space<semaphore_mem>>
    %38 = tpu.memref_squeeze %37 : memref<1x1x!tpu.dma_semaphore, #tpu.memory_space<semaphore_mem>> -> memref<!tpu.dma_semaphore, #tpu.memory_space<semaphore_mem>>
    tpu.enqueue_dma source(%35 : memref<1x128xf32, #tpu.memory_space<any>>) target(%36 : memref<1x128xf32, #tpu.memory_space<vmem>>) target_semaphore(%38 : memref<!tpu.dma_semaphore, #tpu.memory_space<semaphore_mem>>)
    %c1_i32_28 = arith.constant 1 : i32
    %c2_i32_29 = arith.constant 2 : i32
    %c0_i32_30 = arith.constant 0 : i32
    %39 = tpu.memref_slice %arg4[%34, %c0_i32_30] : memref<32x128xf32, #tpu.memory_space<any>> -> memref<1x128xf32, #tpu.memory_space<any>>
    %c2_i32_31 = arith.constant 2 : i32
    %c0_i32_32 = arith.constant 0 : i32
    %40 = tpu.memref_slice %arg7[%c2_i32_31, %c0_i32_32] : memref<4x128xf32, #tpu.memory_space<vmem>> -> memref<1x128xf32, #tpu.memory_space<vmem>>
    %41 = tpu.memref_slice %arg8[%c1_i32_28, %c2_i32_29] : memref<2x4x!tpu.dma_semaphore, #tpu.memory_space<semaphore_mem>> -> memref<1x1x!tpu.dma_semaphore, #tpu.memory_space<semaphore_mem>>
    %42 = tpu.memref_squeeze %41 : memref<1x1x!tpu.dma_semaphore, #tpu.memory_space<semaphore_mem>> -> memref<!tpu.dma_semaphore, #tpu.memory_space<semaphore_mem>>
    tpu.enqueue_dma source(%39 : memref<1x128xf32, #tpu.memory_space<any>>) target(%40 : memref<1x128xf32, #tpu.memory_space<vmem>>) target_semaphore(%42 : memref<!tpu.dma_semaphore, #tpu.memory_space<semaphore_mem>>)
    %c3_i32 = arith.constant 3 : i32
    %43 = arith.addi %0, %c3_i32 : i32
    %44 = arith.index_cast %43 : i32 to index
    %45 = memref.load %arg1[%44] : memref<8xi32, #tpu.memory_space<smem>>
    %c3_i32_33 = arith.constant 3 : i32
    %46 = arith.addi %0, %c3_i32_33 : i32
    %47 = arith.index_cast %46 : i32 to index
    %48 = memref.load %arg2[%47] : memref<8xi32, #tpu.memory_space<smem>>
    %c0_i32_34 = arith.constant 0 : i32
    %c3_i32_35 = arith.constant 3 : i32
    %c0_i32_36 = arith.constant 0 : i32
    %49 = tpu.memref_slice %arg3[%45, %c0_i32_36] : memref<32x128xf32, #tpu.memory_space<any>> -> memref<1x128xf32, #tpu.memory_space<any>>
    %c3_i32_37 = arith.constant 3 : i32
    %c0_i32_38 = arith.constant 0 : i32
    %50 = tpu.memref_slice %arg6[%c3_i32_37, %c0_i32_38] : memref<4x128xf32, #tpu.memory_space<vmem>> -> memref<1x128xf32, #tpu.memory_space<vmem>>
    %51 = tpu.memref_slice %arg8[%c0_i32_34, %c3_i32_35] : memref<2x4x!tpu.dma_semaphore, #tpu.memory_space<semaphore_mem>> -> memref<1x1x!tpu.dma_semaphore, #tpu.memory_space<semaphore_mem>>
    %52 = tpu.memref_squeeze %51 : memref<1x1x!tpu.dma_semaphore, #tpu.memory_space<semaphore_mem>> -> memref<!tpu.dma_semaphore, #tpu.memory_space<semaphore_mem>>
    tpu.enqueue_dma source(%49 : memref<1x128xf32, #tpu.memory_space<any>>) target(%50 : memref<1x128xf32, #tpu.memory_space<vmem>>) target_semaphore(%52 : memref<!tpu.dma_semaphore, #tpu.memory_space<semaphore_mem>>)
    %c1_i32_39 = arith.constant 1 : i32
    %c3_i32_40 = arith.constant 3 : i32
    %c0_i32_41 = arith.constant 0 : i32
    %53 = tpu.memref_slice %arg4[%48, %c0_i32_41] : memref<32x128xf32, #tpu.memory_space<any>> -> memref<1x128xf32, #tpu.memory_space<any>>
    %c3_i32_42 = arith.constant 3 : i32
    %c0_i32_43 = arith.constant 0 : i32
    %54 = tpu.memref_slice %arg7[%c3_i32_42, %c0_i32_43] : memref<4x128xf32, #tpu.memory_space<vmem>> -> memref<1x128xf32, #tpu.memory_space<vmem>>
    %55 = tpu.memref_slice %arg8[%c1_i32_39, %c3_i32_40] : memref<2x4x!tpu.dma_semaphore, #tpu.memory_space<semaphore_mem>> -> memref<1x1x!tpu.dma_semaphore, #tpu.memory_space<semaphore_mem>>
    %56 = tpu.memref_squeeze %55 : memref<1x1x!tpu.dma_semaphore, #tpu.memory_space<semaphore_mem>> -> memref<!tpu.dma_semaphore, #tpu.memory_space<semaphore_mem>>
    tpu.enqueue_dma source(%53 : memref<1x128xf32, #tpu.memory_space<any>>) target(%54 : memref<1x128xf32, #tpu.memory_space<vmem>>) target_semaphore(%56 : memref<!tpu.dma_semaphore, #tpu.memory_space<semaphore_mem>>)
    %c0_i32_44 = arith.constant 0 : i32
    %c0_i32_45 = arith.constant 0 : i32
    %c0_i32_46 = arith.constant 0 : i32
    %57 = tpu.memref_slice %arg3[%3, %c0_i32_46] : memref<32x128xf32, #tpu.memory_space<any>> -> memref<1x128xf32, #tpu.memory_space<any>>
    %c0_i32_47 = arith.constant 0 : i32
    %c0_i32_48 = arith.constant 0 : i32
    %58 = tpu.memref_slice %arg6[%c0_i32_47, %c0_i32_48] : memref<4x128xf32, #tpu.memory_space<vmem>> -> memref<1x128xf32, #tpu.memory_space<vmem>>
    %59 = tpu.memref_slice %arg8[%c0_i32_44, %c0_i32_45] : memref<2x4x!tpu.dma_semaphore, #tpu.memory_space<semaphore_mem>> -> memref<1x1x!tpu.dma_semaphore, #tpu.memory_space<semaphore_mem>>
    %60 = tpu.memref_squeeze %59 : memref<1x1x!tpu.dma_semaphore, #tpu.memory_space<semaphore_mem>> -> memref<!tpu.dma_semaphore, #tpu.memory_space<semaphore_mem>>
    tpu.wait_dma2 semaphore(%60 : memref<!tpu.dma_semaphore, #tpu.memory_space<semaphore_mem>>) src(%57 : memref<1x128xf32, #tpu.memory_space<any>>) dst(%58 : memref<1x128xf32, #tpu.memory_space<vmem>>)
    %c1_i32_49 = arith.constant 1 : i32
    %c0_i32_50 = arith.constant 0 : i32
    %c0_i32_51 = arith.constant 0 : i32
    %61 = tpu.memref_slice %arg4[%6, %c0_i32_51] : memref<32x128xf32, #tpu.memory_space<any>> -> memref<1x128xf32, #tpu.memory_space<any>>
    %c0_i32_52 = arith.constant 0 : i32
    %c0_i32_53 = arith.constant 0 : i32
    %62 = tpu.memref_slice %arg7[%c0_i32_52, %c0_i32_53] : memref<4x128xf32, #tpu.memory_space<vmem>> -> memref<1x128xf32, #tpu.memory_space<vmem>>
    %63 = tpu.memref_slice %arg8[%c1_i32_49, %c0_i32_50] : memref<2x4x!tpu.dma_semaphore, #tpu.memory_space<semaphore_mem>> -> memref<1x1x!tpu.dma_semaphore, #tpu.memory_space<semaphore_mem>>
    %64 = tpu.memref_squeeze %63 : memref<1x1x!tpu.dma_semaphore, #tpu.memory_space<semaphore_mem>> -> memref<!tpu.dma_semaphore, #tpu.memory_space<semaphore_mem>>
    tpu.wait_dma2 semaphore(%64 : memref<!tpu.dma_semaphore, #tpu.memory_space<semaphore_mem>>) src(%61 : memref<1x128xf32, #tpu.memory_space<any>>) dst(%62 : memref<1x128xf32, #tpu.memory_space<vmem>>)
    %c0_i32_54 = arith.constant 0 : i32
    %c1_i32_55 = arith.constant 1 : i32
    %c0_i32_56 = arith.constant 0 : i32
    %65 = tpu.memref_slice %arg3[%17, %c0_i32_56] : memref<32x128xf32, #tpu.memory_space<any>> -> memref<1x128xf32, #tpu.memory_space<any>>
    %c1_i32_57 = arith.constant 1 : i32
    %c0_i32_58 = arith.constant 0 : i32
    %66 = tpu.memref_slice %arg6[%c1_i32_57, %c0_i32_58] : memref<4x128xf32, #tpu.memory_space<vmem>> -> memref<1x128xf32, #tpu.memory_space<vmem>>
    %67 = tpu.memref_slice %arg8[%c0_i32_54, %c1_i32_55] : memref<2x4x!tpu.dma_semaphore, #tpu.memory_space<semaphore_mem>> -> memref<1x1x!tpu.dma_semaphore, #tpu.memory_space<semaphore_mem>>
    %68 = tpu.memref_squeeze %67 : memref<1x1x!tpu.dma_semaphore, #tpu.memory_space<semaphore_mem>> -> memref<!tpu.dma_semaphore, #tpu.memory_space<semaphore_mem>>
    tpu.wait_dma2 semaphore(%68 : memref<!tpu.dma_semaphore, #tpu.memory_space<semaphore_mem>>) src(%65 : memref<1x128xf32, #tpu.memory_space<any>>) dst(%66 : memref<1x128xf32, #tpu.memory_space<vmem>>)
    %c1_i32_59 = arith.constant 1 : i32
    %c1_i32_60 = arith.constant 1 : i32
    %c0_i32_61 = arith.constant 0 : i32
    %69 = tpu.memref_slice %arg4[%20, %c0_i32_61] : memref<32x128xf32, #tpu.memory_space<any>> -> memref<1x128xf32, #tpu.memory_space<any>>
    %c1_i32_62 = arith.constant 1 : i32
    %c0_i32_63 = arith.constant 0 : i32
    %70 = tpu.memref_slice %arg7[%c1_i32_62, %c0_i32_63] : memref<4x128xf32, #tpu.memory_space<vmem>> -> memref<1x128xf32, #tpu.memory_space<vmem>>
    %71 = tpu.memref_slice %arg8[%c1_i32_59, %c1_i32_60] : memref<2x4x!tpu.dma_semaphore, #tpu.memory_space<semaphore_mem>> -> memref<1x1x!tpu.dma_semaphore, #tpu.memory_space<semaphore_mem>>
    %72 = tpu.memref_squeeze %71 : memref<1x1x!tpu.dma_semaphore, #tpu.memory_space<semaphore_mem>> -> memref<!tpu.dma_semaphore, #tpu.memory_space<semaphore_mem>>
    tpu.wait_dma2 semaphore(%72 : memref<!tpu.dma_semaphore, #tpu.memory_space<semaphore_mem>>) src(%69 : memref<1x128xf32, #tpu.memory_space<any>>) dst(%70 : memref<1x128xf32, #tpu.memory_space<vmem>>)
    %c0_i32_64 = arith.constant 0 : i32
    %c2_i32_65 = arith.constant 2 : i32
    %c0_i32_66 = arith.constant 0 : i32
    %73 = tpu.memref_slice %arg3[%31, %c0_i32_66] : memref<32x128xf32, #tpu.memory_space<any>> -> memref<1x128xf32, #tpu.memory_space<any>>
    %c2_i32_67 = arith.constant 2 : i32
    %c0_i32_68 = arith.constant 0 : i32
    %74 = tpu.memref_slice %arg6[%c2_i32_67, %c0_i32_68] : memref<4x128xf32, #tpu.memory_space<vmem>> -> memref<1x128xf32, #tpu.memory_space<vmem>>
    %75 = tpu.memref_slice %arg8[%c0_i32_64, %c2_i32_65] : memref<2x4x!tpu.dma_semaphore, #tpu.memory_space<semaphore_mem>> -> memref<1x1x!tpu.dma_semaphore, #tpu.memory_space<semaphore_mem>>
    %76 = tpu.memref_squeeze %75 : memref<1x1x!tpu.dma_semaphore, #tpu.memory_space<semaphore_mem>> -> memref<!tpu.dma_semaphore, #tpu.memory_space<semaphore_mem>>
    tpu.wait_dma2 semaphore(%76 : memref<!tpu.dma_semaphore, #tpu.memory_space<semaphore_mem>>) src(%73 : memref<1x128xf32, #tpu.memory_space<any>>) dst(%74 : memref<1x128xf32, #tpu.memory_space<vmem>>)
    %c1_i32_69 = arith.constant 1 : i32
    %c2_i32_70 = arith.constant 2 : i32
    %c0_i32_71 = arith.constant 0 : i32
    %77 = tpu.memref_slice %arg4[%34, %c0_i32_71] : memref<32x128xf32, #tpu.memory_space<any>> -> memref<1x128xf32, #tpu.memory_space<any>>
    %c2_i32_72 = arith.constant 2 : i32
    %c0_i32_73 = arith.constant 0 : i32
    %78 = tpu.memref_slice %arg7[%c2_i32_72, %c0_i32_73] : memref<4x128xf32, #tpu.memory_space<vmem>> -> memref<1x128xf32, #tpu.memory_space<vmem>>
    %79 = tpu.memref_slice %arg8[%c1_i32_69, %c2_i32_70] : memref<2x4x!tpu.dma_semaphore, #tpu.memory_space<semaphore_mem>> -> memref<1x1x!tpu.dma_semaphore, #tpu.memory_space<semaphore_mem>>
    %80 = tpu.memref_squeeze %79 : memref<1x1x!tpu.dma_semaphore, #tpu.memory_space<semaphore_mem>> -> memref<!tpu.dma_semaphore, #tpu.memory_space<semaphore_mem>>
    tpu.wait_dma2 semaphore(%80 : memref<!tpu.dma_semaphore, #tpu.memory_space<semaphore_mem>>) src(%77 : memref<1x128xf32, #tpu.memory_space<any>>) dst(%78 : memref<1x128xf32, #tpu.memory_space<vmem>>)
    %c0_i32_74 = arith.constant 0 : i32
    %c3_i32_75 = arith.constant 3 : i32
    %c0_i32_76 = arith.constant 0 : i32
    %81 = tpu.memref_slice %arg3[%45, %c0_i32_76] : memref<32x128xf32, #tpu.memory_space<any>> -> memref<1x128xf32, #tpu.memory_space<any>>
    %c3_i32_77 = arith.constant 3 : i32
    %c0_i32_78 = arith.constant 0 : i32
    %82 = tpu.memref_slice %arg6[%c3_i32_77, %c0_i32_78] : memref<4x128xf32, #tpu.memory_space<vmem>> -> memref<1x128xf32, #tpu.memory_space<vmem>>
    %83 = tpu.memref_slice %arg8[%c0_i32_74, %c3_i32_75] : memref<2x4x!tpu.dma_semaphore, #tpu.memory_space<semaphore_mem>> -> memref<1x1x!tpu.dma_semaphore, #tpu.memory_space<semaphore_mem>>
    %84 = tpu.memref_squeeze %83 : memref<1x1x!tpu.dma_semaphore, #tpu.memory_space<semaphore_mem>> -> memref<!tpu.dma_semaphore, #tpu.memory_space<semaphore_mem>>
    tpu.wait_dma2 semaphore(%84 : memref<!tpu.dma_semaphore, #tpu.memory_space<semaphore_mem>>) src(%81 : memref<1x128xf32, #tpu.memory_space<any>>) dst(%82 : memref<1x128xf32, #tpu.memory_space<vmem>>)
    %c1_i32_79 = arith.constant 1 : i32
    %c3_i32_80 = arith.constant 3 : i32
    %c0_i32_81 = arith.constant 0 : i32
    %85 = tpu.memref_slice %arg4[%48, %c0_i32_81] : memref<32x128xf32, #tpu.memory_space<any>> -> memref<1x128xf32, #tpu.memory_space<any>>
    %c3_i32_82 = arith.constant 3 : i32
    %c0_i32_83 = arith.constant 0 : i32
    %86 = tpu.memref_slice %arg7[%c3_i32_82, %c0_i32_83] : memref<4x128xf32, #tpu.memory_space<vmem>> -> memref<1x128xf32, #tpu.memory_space<vmem>>
    %87 = tpu.memref_slice %arg8[%c1_i32_79, %c3_i32_80] : memref<2x4x!tpu.dma_semaphore, #tpu.memory_space<semaphore_mem>> -> memref<1x1x!tpu.dma_semaphore, #tpu.memory_space<semaphore_mem>>
    %88 = tpu.memref_squeeze %87 : memref<1x1x!tpu.dma_semaphore, #tpu.memory_space<semaphore_mem>> -> memref<!tpu.dma_semaphore, #tpu.memory_space<semaphore_mem>>
    tpu.wait_dma2 semaphore(%88 : memref<!tpu.dma_semaphore, #tpu.memory_space<semaphore_mem>>) src(%85 : memref<1x128xf32, #tpu.memory_space<any>>) dst(%86 : memref<1x128xf32, #tpu.memory_space<vmem>>)
    %c0 = arith.constant 0 : index
    %c0_84 = arith.constant 0 : index
    %89 = vector.load %arg6[%c0, %c0_84] : memref<4x128xf32, #tpu.memory_space<vmem>>, vector<4x128xf32>
    %c0_85 = arith.constant 0 : index
    %c0_86 = arith.constant 0 : index
    %90 = vector.load %arg7[%c0_85, %c0_86] : memref<4x128xf32, #tpu.memory_space<vmem>>, vector<4x128xf32>
    %91 = arith.mulf %89, %90 : vector<4x128xf32>
    %cst = arith.constant dense<0.000000e+00> : vector<4xf32>
    %92 = vector.multi_reduction <add>, %91, %cst [1] : vector<4x128xf32> to vector<4xf32>
    %93 = vector.shape_cast %92 : vector<4xf32> to vector<4x1xf32>
    %cst_87 = arith.constant 0.000000e+00 : f32
    %94 = vector.broadcast %cst_87 : f32 to vector<4x1xf32>
    %95 = arith.minimumf %93, %94 : vector<4x1xf32>
    %96 = math.absf %93 : vector<4x1xf32>
    %cst_88 = arith.constant 0.000000e+00 : f32
    %97 = vector.broadcast %cst_88 : f32 to vector<4x1xf32>
    %98 = arith.subf %97, %96 : vector<4x1xf32>
    %99 = math.exp %98 : vector<4x1xf32>
    %cst_89 = arith.constant 1.000000e+00 : f32
    %100 = vector.broadcast %cst_89 : f32 to vector<4x1xf32>
    %101 = arith.addf %100, %99 : vector<4x1xf32>
    %102 = math.log %101 : vector<4x1xf32>
    %103 = arith.subf %95, %102 : vector<4x1xf32>
    %cst_90 = arith.constant dense<0.000000e+00> : vector<1xf32>
    %104 = vector.multi_reduction <add>, %103, %cst_90 [0] : vector<4x1xf32> to vector<1xf32>
    %105 = vector.shape_cast %104 : vector<1xf32> to vector<1x1xf32>
    %c0_91 = arith.constant 0 : index
    %c0_92 = arith.constant 0 : index
    %c0_93 = arith.constant 0 : index
    %106 = vector.load %arg5[%c0_91, %c0_92, %c0_93] : memref<1x1x1xf32, #tpu.memory_space<vmem>>, vector<1x1x1xf32>
    %107 = vector.shape_cast %106 : vector<1x1x1xf32> to vector<1x1xf32>
    %108 = vector.shape_cast %105 : vector<1x1xf32> to vector<1x1x1xf32>
    tpu.vector_store %arg5[%c0_91, %c0_92, %c0_93], %108 {strides = array<i32>} : memref<1x1x1xf32, #tpu.memory_space<vmem>>, vector<1x1x1xf32>,
    return
  }
  func.func @transform_2(%arg0: i32, %arg1: memref<8xi32, #tpu.memory_space<smem>>, %arg2: memref<8xi32, #tpu.memory_space<smem>>) -> (i32, i32, i32) {
    %c0_i32 = arith.constant 0 : i32
    %c0_i32_0 = arith.constant 0 : i32
    %c0_i32_1 = arith.constant 0 : i32
    return %arg0, %c0_i32, %c0_i32_0 : i32, i32, i32
  }
}

</mosaic_0001>

<bundles_post_ra>
// kernel: tpu_custom_call.1
= control target key start
LH: loop header
LB: loop body
LE: loop exit
PB: predicated region body
PF: predicated region fallthrough
CT: control target
= control target key end

     0   :  { %s595_s15 = smov [#allocation6]   ;;  %s803_s0 = inlined_call_operand.hbm [shape: s32[8], index: 0, kind: input, shape index: {}]   ;;  %s804_s2 = inlined_call_operand.hbm [shape: f32[32,128], index: 2, kind: input, shape index: {}]   ;;  %s805_s3 = inlined_call_operand.hbm [shape: f32[32,128], index: 3, kind: input, shape index: {}]   ;;  %s806_s4 = inlined_call_operand.vmem [shape: f32[2,1,1], index: 4, kind: output, shape index: {}]   ;;  %s807_s1 = inlined_call_operand.vmem [shape: s32[8], index: 1, kind: input, shape index: {}]  }
   0x1   :  { %10 = dma.hbm_to_smem %s803_s0, 16, %s595_s15, [#allocation5] }
   0x2   :  { %s11_s20 = sshll.u32 %s807_s1, 4  ;;  %s12_s20 = int_to_ptr.vmem [resolvable:$true] %s11_s20 }
   0x3   :  { %s381_s21 = scalar_lea.vmem %s12_s20, 16  ;;  %p386_p1 = scmp.lt.s32.totalorder %s12_s20, %s12_s20 }
   0x4   :  { %p382_p0 = scmp.ne.s32.totalorder %s12_s20, %s381_s21  ;;  %p387_p2 = scmp.lt.s32.totalorder %s381_s21, %s381_s21 }
   0x6   :  { %p388_p3 = por %p387_p2, %p386_p1 }
   0x8   :  { %p389_p4 = pnand %p388_p3, %p382_p0 }
   0xa   :  { %392 = shalt.err (!%p389_p4)  }
   0xb   :  { %s596_s22 = smov [#allocation7]  }
   0xc   :  { %14 = dma.vmem_to_smem %s12_s20, 16, %s596_s22, [#allocation5] }
   0xd   :  { %573 = dma.done.wait [#allocation5], 32 }
   0xe   :  { %574 = vsyncadd [#allocation5], 4294967264 }
   0xf   :  { %16 = sfence }
  0x10   :  { %s636_s23 = smov 0  }
  0x11 LB: > { %p331_p5 = scmp.ge.s32.totalorder %s593_s23, 2  ;;  %s593_s23 = sphi %s636_s23, %s22_s23  }
  0x12   : > { %p53_p6 = scmp.lt.s32.totalorder (!%p331_p5), %s593_s23, 1  ;;  %s644_s0 = sshll.u32 (!%p331_p5), %s593_s23, 2 }
  0x13   : > { %47 = sbr.rel (%p331_p5) target bundleno = 399 (0x18f), region = 12  ;;  %s57_s1 = sld [smem:[#allocation6 + %s644_s0]] (!%p331_p5) }
  0x14   : > { %s597_s25 = smov (!%p331_p5), [#allocation2]   ;;  %s651_s27 = sld [smem:[#allocation7 + %s644_s0]] (!%p331_p5) }
  0x15   : > { %s68_s26 = sshll.u32 (!%p331_p5), %s597_s25, 4  ;;  %s86_s5 = sadd.s32 (!%p331_p5), 1, %s644_s0  ;;  %s657_s26 = int_to_ptr.vmem [resolvable:$true] %s68_s26 }
  0x16   : > { %s598_s6 = smov (!%p331_p5), [#allocation3]   ;;  %s662_s8 = sld [smem:[#allocation6 + %s86_s5]] (!%p331_p5) }
  0x17   : > { %s82_s7 = sshll.u32 (!%p331_p5), %s598_s6, 4  ;;  %s672_s16 = scalar_lea.hbm (!%p331_p5), %s804_s2, 512  ;;  %s664_s7 = int_to_ptr.vmem [resolvable:$true] %s82_s7 }
  0x18   : > { %s648_s24 = scalar_select %p53_p6, %s593_s23, 1 }
  0x19   : > { %s333_s9 = sshll.u32 %s57_s1, 4 }
  0x1a   : > { %s55_s30 = scalar_lea.vmem %s806_s4, %s648_s24  ;;  %s60_s12 = scalar_lea.hbm %s804_s2, %s333_s9 }
  0x1b   : > { %s393_s13 = scalar_lea.hbm %s60_s12, 16  ;;  %p396_p8 = scmp.lt.s32.totalorder %s60_s12, %s804_s2 }
  0x1c   : > { %p394_p7 = scmp.ne.s32.totalorder %s60_s12, %s393_s13  ;;  %p397_p9 = scmp.lt.s32.totalorder %s672_s16, %s393_s13 }
  0x1e   : > { %p398_p10 = por %p397_p9, %p396_p8 }
  0x20   : > { %p399_p11 = pnand %p398_p10, %p394_p7 }
  0x22   : > { %402 = shalt.err (!%p399_p11)  }
  0x23   : > { %s403_s19 = scalar_lea.vmem %s657_s26, 16  ;;  %s681_s20 = scalar_lea.vmem %s657_s26, 64 }
  0x24   : > { %p404_p12 = scmp.ne.s32.totalorder %s657_s26, %s403_s19  ;;  %p408_p13 = scmp.lt.s32.totalorder %s657_s26, %s657_s26 }
  0x25   : > { %p409_p0 = scmp.lt.s32.totalorder %s681_s20, %s403_s19 }
  0x27   : > { %p410_p1 = por %p409_p0, %p408_p13 }
  0x29   : > { %p411_p2 = pnand %p410_p1, %p404_p12 }
  0x2b   : > { %414 = shalt.err (!%p411_p2)  }
  0x2c   : > { %71 = dma.hbm_to_vmem [thread:$0]  %s60_s12, 16, %s657_s26, [#allocation4] }
  0x2d   : > { %s334_s21 = sshll.u32 %s651_s27, 4  ;;  %s599_s22 = smov [#allocation2 + $0x1]  }
  0x2e   : > { %s100_s1 = sshll.u32 %s599_s22, 4  ;;  %s73_s29 = scalar_lea.hbm %s805_s3, %s334_s21  ;;  %s691_s1 = int_to_ptr.vmem [resolvable:$true] %s100_s1 }
  0x2f   : > { %s415_s6 = scalar_lea.hbm %s73_s29, 16  ;;  %s696_s11 = scalar_lea.hbm %s805_s3, 512 }
  0x30   : > { %p416_p3 = scmp.ne.s32.totalorder %s73_s29, %s415_s6  ;;  %p418_p4 = scmp.lt.s32.totalorder %s73_s29, %s805_s3 }
  0x31   : > { %p419_p5 = scmp.lt.s32.totalorder %s696_s11, %s415_s6 }
  0x33   : > { %p420_p6 = por %p419_p5, %p418_p4 }
  0x35   : > { %p421_p7 = pnand %p420_p6, %p416_p3 }
  0x37   : > { %424 = shalt.err (!%p421_p7)  }
  0x38   : > { %s425_s27 = scalar_lea.vmem %s664_s7, 16  ;;  %s705_s12 = scalar_lea.vmem %s664_s7, 64 }
  0x39   : > { %p426_p8 = scmp.ne.s32.totalorder %s664_s7, %s425_s27  ;;  %p430_p9 = scmp.lt.s32.totalorder %s664_s7, %s664_s7 }
  0x3a   : > { %p431_p10 = scmp.lt.s32.totalorder %s705_s12, %s425_s27 }
  0x3c   : > { %p432_p11 = por %p431_p10, %p430_p9 }
  0x3e   : > { %p433_p12 = pnand %p432_p11, %p426_p8 }
  0x40   : > { %436 = shalt.err (!%p433_p12)  }
  0x41   : > { %85 = dma.hbm_to_vmem [thread:$0]  %s73_s29, 16, %s664_s7, [#allocation4 + $0x4] }
  0x42   : > { %s335_s15 = sshll.u32 %s662_s8, 4  ;;  %s88_s17 = sld [smem:[#allocation7 + %s86_s5]] }
  0x43   : > { %s90_s21 = scalar_lea.hbm %s804_s2, %s335_s15 }
  0x44   : > { %s437_s22 = scalar_lea.hbm %s90_s21, 16  ;;  %p440_p0 = scmp.lt.s32.totalorder %s90_s21, %s804_s2 }
  0x45   : > { %p438_p13 = scmp.ne.s32.totalorder %s90_s21, %s437_s22  ;;  %p441_p1 = scmp.lt.s32.totalorder %s672_s16, %s437_s22 }
  0x47   : > { %p442_p2 = por %p441_p1, %p440_p0 }
  0x49   : > { %p443_p3 = pnand %p442_p2, %p438_p13 }
  0x4b   : > { %446 = shalt.err (!%p443_p3)  }
  0x4c   : > { %s447_s5 = scalar_lea.vmem %s691_s1, 16  ;;  %p452_p5 = scmp.lt.s32.totalorder %s691_s1, %s657_s26 }
  0x4d   : > { %p448_p4 = scmp.ne.s32.totalorder %s691_s1, %s447_s5  ;;  %p453_p6 = scmp.lt.s32.totalorder %s681_s20, %s447_s5 }
  0x4f   : > { %p454_p7 = por %p453_p6, %p452_p5 }
  0x51   : > { %p455_p8 = pnand %p454_p7, %p448_p4 }
  0x53   : > { %458 = shalt.err (!%p455_p8)  }
  0x54   : > { %103 = dma.hbm_to_vmem [thread:$0]  %s90_s21, 16, %s691_s1, [#allocation4 + $0x1] }
  0x55   : > { %s600_s8 = smov [#allocation3 + $0x1]   ;;  %s119_s6 = sadd.s32 2, %s644_s0 }
  0x56   : > { %s115_s29 = sshll.u32 %s600_s8, 4  ;;  %s120_s9 = sld [smem:[#allocation6 + %s119_s6]]  ;;  %s116_s29 = int_to_ptr.vmem [resolvable:$true] %s115_s29 }
  0x57   : > { %s728_s10 = sld [smem:[#allocation7 + %s119_s6]]  ;;  %s336_s13 = sshll.u32 %s88_s17, 4 }
  0x58   : > { %s601_s14 = smov [#allocation2 + $0x2]   ;;  %s105_s19 = scalar_lea.hbm %s805_s3, %s336_s13 }
  0x59   : > { %s133_s27 = sshll.u32 %s601_s14, 4  ;;  %s459_s22 = scalar_lea.hbm %s105_s19, 16  ;;  %s733_s27 = int_to_ptr.vmem [resolvable:$true] %s133_s27 }
  0x5a   : > { %p460_p9 = scmp.ne.s32.totalorder %s105_s19, %s459_s22  ;;  %p462_p10 = scmp.lt.s32.totalorder %s105_s19, %s805_s3 }
  0x5b   : > { %p463_p11 = scmp.lt.s32.totalorder %s696_s11, %s459_s22 }
  0x5d   : > { %p464_p12 = por %p463_p11, %p462_p10 }
  0x5f   : > { %p465_p13 = pnand %p464_p12, %p460_p9 }
  0x61   : > { %468 = shalt.err (!%p465_p13)  }
  0x62   : > { %s469_s21 = scalar_lea.vmem %s116_s29, 16  ;;  %p474_p1 = scmp.lt.s32.totalorder %s116_s29, %s664_s7 }
  0x63   : > { %p470_p0 = scmp.ne.s32.totalorder %s116_s29, %s469_s21  ;;  %p475_p2 = scmp.lt.s32.totalorder %s705_s12, %s469_s21 }
  0x65   : > { %p476_p3 = por %p475_p2, %p474_p1 }
  0x67   : > { %p477_p4 = pnand %p476_p3, %p470_p0 }
  0x69   : > { %480 = shalt.err (!%p477_p4)  }
  0x6a   : > { %118 = dma.hbm_to_vmem [thread:$0]  %s105_s19, 16, %s116_s29, [#allocation4 + $0x5] }
  0x6b   : > { %s152_s17 = sadd.s32 3, %s644_s0  ;;  %s337_s28 = sshll.u32 %s120_s9, 4 }
  0x6c   : > { %s602_s5 = smov [#allocation3 + $0x2]   ;;  %s123_s14 = scalar_lea.hbm %s804_s2, %s337_s28 }
  0x6d   : > { %s148_s8 = sshll.u32 %s602_s5, 4  ;;  %s338_s15 = sshll.u32 %s728_s10, 4  ;;  %s149_s8 = int_to_ptr.vmem [resolvable:$true] %s148_s8 }
  0x6e   : > { %s481_s18 = scalar_lea.hbm %s123_s14, 16  ;;  %p484_p6 = scmp.lt.s32.totalorder %s123_s14, %s804_s2 }
  0x6f   : > { %p482_p5 = scmp.ne.s32.totalorder %s123_s14, %s481_s18  ;;  %p485_p7 = scmp.lt.s32.totalorder %s672_s16, %s481_s18 }
  0x71   : > { %p486_p8 = por %p485_p7, %p484_p6 }
  0x73   : > { %p487_p9 = pnand %p486_p8, %p482_p5 }
  0x75   : > { %490 = shalt.err (!%p487_p9)  }
  0x76   : > { %s491_s29 = scalar_lea.vmem %s733_s27, 16  ;;  %p496_p11 = scmp.lt.s32.totalorder %s733_s27, %s657_s26 }
  0x77   : > { %p492_p10 = scmp.ne.s32.totalorder %s733_s27, %s491_s29  ;;  %p497_p12 = scmp.lt.s32.totalorder %s681_s20, %s491_s29 }
  0x79   : > { %p498_p13 = por %p497_p12, %p496_p11 }
  0x7b   : > { %p499_p0 = pnand %p498_p13, %p492_p10 }
  0x7d   : > { %502 = shalt.err (!%p499_p0)  }
  0x7e   : > { %136 = dma.hbm_to_vmem [thread:$0]  %s123_s14, 16, %s733_s27, [#allocation4 + $0x2] }
  0x7f   : > { %s138_s19 = scalar_lea.hbm %s805_s3, %s338_s15 }
  0x80   : > { %s503_s1 = scalar_lea.hbm %s138_s19, 16  ;;  %p506_p2 = scmp.lt.s32.totalorder %s138_s19, %s805_s3 }
  0x81   : > { %p504_p1 = scmp.ne.s32.totalorder %s138_s19, %s503_s1  ;;  %p507_p3 = scmp.lt.s32.totalorder %s696_s11, %s503_s1 }
  0x83   : > { %p508_p4 = por %p507_p3, %p506_p2 }
  0x85   : > { %p509_p5 = pnand %p508_p4, %p504_p1 }
  0x87   : > { %512 = shalt.err (!%p509_p5)  }
  0x88   : > { %s513_s5 = scalar_lea.vmem %s149_s8, 16  ;;  %p518_p7 = scmp.lt.s32.totalorder %s149_s8, %s664_s7 }
  0x89   : > { %p514_p6 = scmp.ne.s32.totalorder %s149_s8, %s513_s5  ;;  %p519_p8 = scmp.lt.s32.totalorder %s705_s12, %s513_s5 }
  0x8b   : > { %p520_p9 = por %p519_p8, %p518_p7 }
  0x8d   : > { %p521_p10 = pnand %p520_p9, %p514_p6 }
  0x8f   : > { %524 = shalt.err (!%p521_p10)  }
  0x90   : > { %151 = dma.hbm_to_vmem [thread:$0]  %s138_s19, 16, %s149_s8, [#allocation4 + $0x6] }
  0x91   : > { %s153_s27 = sld [smem:[#allocation6 + %s152_s17]]  ;;  %s603_s13 = smov [#allocation2 + $0x3]  }
  0x92   : > { %s154_s6 = sld [smem:[#allocation7 + %s152_s17]]  ;;  %s166_s14 = sshll.u32 %s603_s13, 4  ;;  %s167_s14 = int_to_ptr.vmem [resolvable:$true] %s166_s14 }
  0x93   : > { %s604_s15 = smov [#allocation3 + $0x3]  }
  0x94   : > { %s181_s18 = sshll.u32 %s604_s15, 4  ;;  %s769_s18 = int_to_ptr.vmem [resolvable:$true] %s181_s18 }
  0x97   : > { %s339_s22 = sshll.u32 %s153_s27, 4 }
  0x98   : > { %s156_s9 = scalar_lea.hbm %s804_s2, %s339_s22  ;;  %s340_s8 = sshll.u32 %s154_s6, 4 }
  0x99   : > { %s525_s10 = scalar_lea.hbm %s156_s9, 16  ;;  %p528_p12 = scmp.lt.s32.totalorder %s156_s9, %s804_s2 }
  0x9a   : > { %p526_p11 = scmp.ne.s32.totalorder %s156_s9, %s525_s10  ;;  %p529_p13 = scmp.lt.s32.totalorder %s672_s16, %s525_s10 }
  0x9c   : > { %p530_p0 = por %p529_p13, %p528_p12 }
  0x9e   : > { %p531_p1 = pnand %p530_p0, %p526_p11 }
  0xa0   : > { %534 = shalt.err (!%p531_p1)  }
  0xa1   : > { %s535_s0 = scalar_lea.vmem %s167_s14, 16  ;;  %p540_p3 = scmp.lt.s32.totalorder %s167_s14, %s657_s26 }
  0xa2   : > { %p536_p2 = scmp.ne.s32.totalorder %s167_s14, %s535_s0  ;;  %p541_p4 = scmp.lt.s32.totalorder %s681_s20, %s535_s0 }
  0xa4   : > { %p542_p5 = por %p541_p4, %p540_p3 }
  0xa6   : > { %p543_p6 = pnand %p542_p5, %p536_p2 }
  0xa8   : > { %546 = shalt.err (!%p543_p6)  }
  0xa9   : > { %169 = dma.hbm_to_vmem [thread:$0]  %s156_s9, 16, %s167_s14, [#allocation4 + $0x3] }
  0xaa   : > { %s171_s28 = scalar_lea.hbm %s805_s3, %s340_s8 }
  0xab   : > { %s547_s5 = scalar_lea.hbm %s171_s28, 16  ;;  %p550_p8 = scmp.lt.s32.totalorder %s171_s28, %s805_s3 }
  0xac   : > { %p548_p7 = scmp.ne.s32.totalorder %s171_s28, %s547_s5  ;;  %p551_p9 = scmp.lt.s32.totalorder %s696_s11, %s547_s5 }
  0xae   : > { %p552_p10 = por %p551_p9, %p550_p8 }
  0xb0   : > { %p553_p11 = pnand %p552_p10, %p548_p7 }
  0xb2   : > { %556 = shalt.err (!%p553_p11)  }
  0xb3   : > { %s557_s26 = scalar_lea.vmem %s769_s18, 16  ;;  %p562_p13 = scmp.lt.s32.totalorder %s769_s18, %s664_s7 }
  0xb4   : > { %p558_p12 = scmp.ne.s32.totalorder %s769_s18, %s557_s26  ;;  %p563_p0 = scmp.lt.s32.totalorder %s705_s12, %s557_s26 }
  0xb6   : > { %p564_p1 = por %p563_p0, %p562_p13 }
  0xb8   : > { %p565_p2 = pnand %p564_p1, %p558_p12 }
  0xba   : > { %568 = shalt.err (!%p565_p2)  }
  0xbb   : > { %184 = dma.hbm_to_vmem [thread:$0]  %s171_s28, 16, %s769_s18, [#allocation4 + $0x7] }
  0xbc   : > { %575 = dma.done.wait [#allocation4], 16 }
  0xbd   : > { %576 = vsyncadd [#allocation4], 4294967280 }
  0xbe   : > { %577 = dma.done.wait [#allocation4 + $0x4], 16 }
  0xbf   : > { %578 = vsyncadd [#allocation4 + $0x4], 4294967280 }
  0xc0   : > { %579 = dma.done.wait [#allocation4 + $0x1], 16 }
  0xc1   : > { %580 = vsyncadd [#allocation4 + $0x1], 4294967280 }
  0xc2   : > { %581 = dma.done.wait [#allocation4 + $0x5], 16 }
  0xc3   : > { %582 = vsyncadd [#allocation4 + $0x5], 4294967280 }
  0xc4   : > { %583 = dma.done.wait [#allocation4 + $0x2], 16 }
  0xc5   : > { %584 = vsyncadd [#allocation4 + $0x2], 4294967280 }
  0xc6   : > { %585 = dma.done.wait [#allocation4 + $0x6], 16 }
  0xc7   : > { %586 = vsyncadd [#allocation4 + $0x6], 4294967280 }
  0xc8   : > { %587 = dma.done.wait [#allocation4 + $0x3], 16 }
  0xc9   : > { %588 = vsyncadd [#allocation4 + $0x3], 4294967280 }
  0xca   : > { %589 = dma.done.wait [#allocation4 + $0x7], 16 }
  0xcb   : > { %590 = vsyncadd [#allocation4 + $0x7], 4294967280  ;;  %v202_v0 = vld [vmem:[#allocation2] sm:$0xf]  ;;  %v203_v1 = vld [vmem:[#allocation3] sm:$0xf] }
  0xcc   : > { %vm205_vm0 = vcmask 1043456   ;;  %v204_v2 = vmul.f32 %v203_v1, %v202_v0  ;;  %vm225_vm1 = vcmask 0  }
  0xce   : > { %v206_v3 = vsel %vm205_vm0, %v204_v2, 0.0 }
  0xcf   : > { %207 = vadd.xlane.f32.xlu0 %v206_v3 }
 0x158   : > { %v208_v4 = vpop.xlane.xlu0 %207 }
 0x159   : > { %v210_v5 = vand.u32 2147483647, %v208_v4  ;;  %v209_v11 = vmin.f32 %v208_v4, 0.0 }
 0x15b   : > { %v211_v6 = vsub.f32 0.0, %v210_v5 }
 0x15d   : > { %v212_v7 = vmul.f32 1.442695, %v211_v6 }
 0x15f   : > { %369 = vpow2.f32 %v212_v7 }
 0x16c   : > { %v370_v8 = vpop.eup %369 }
 0x16d   : > { %v214_v9 = vadd.f32 1.0, %v370_v8 }
 0x16f   : > { %371 = vlog2.f32 %v214_v9 }
 0x17c   : > { %v372_v10 = vpop.eup %371 }
 0x17d   : > { %v216_v12 = vmul.f32 0.6931472, %v372_v10 }
 0x17f   : > { %v217_v13 = vsub.f32 %v209_v11, %v216_v12 }
 0x181   : > { %v218_v14 = vsel %vm205_vm0, %v217_v13, 0.0 }
 0x182   : > { %v219_v15 = vrot.slane %v218_v14, 4 }
 0x184   : > { %v220_v16 = vadd.f32 %v219_v15, %v218_v14 }
 0x186   : > { %v221_v17 = vrot.slane %v220_v16, 2 }
 0x188   : > { %v222_v18 = vadd.f32 %v221_v17, %v220_v16 }
 0x18a   : > { %v223_v19 = vrot.slane %v222_v18, 1 }
 0x18c   : > { %v224_v20 = vadd.f32 %v223_v19, %v222_v18 }
 0x18e   : > { %226 = vst.msk [vmem:[%s55_s30] sm:$0x1] %vm225_vm1, %v224_v20 }
 0x18f PF: > { %s22_s23 = sadd.s32 1, %s593_s23  }
 0x190   : > { %p19_p3 = scmp.ge.s32.totalorder %s22_s23, 3  }
 0x192   :  { %21 = sbr.rel (!%p19_p3) target bundleno = 17 (0x11), region = 99 }
 0x197   :  { %244 = vsyncmov [#allocation4] }
 0x19a   :  { %s245_s11 = vpop.sfrf %244 }
 0x19b   :  { %p343_p4 = scmp.ne.s32.totalorder %s245_s11, 0 }
 0x19d   :  { %249 = shalt.err (%p343_p4)  }
 0x19e   :  { %251 = vsyncmov [#allocation4 + $0x1] }
 0x1a1   :  { %s252_s12 = vpop.sfrf %251 }
 0x1a2   :  { %p344_p5 = scmp.ne.s32.totalorder %s252_s12, 0 }
 0x1a4   :  { %256 = shalt.err (%p344_p5)  }
 0x1a5   :  { %258 = vsyncmov [#allocation4 + $0x2] }
 0x1a8   :  { %s259_s6 = vpop.sfrf %258 }
 0x1a9   :  { %p345_p6 = scmp.ne.s32.totalorder %s259_s6, 0 }
 0x1ab   :  { %263 = shalt.err (%p345_p6)  }
 0x1ac   :  { %265 = vsyncmov [#allocation4 + $0x3] }
 0x1af   :  { %s266_s24 = vpop.sfrf %265 }
 0x1b0   :  { %p346_p7 = scmp.ne.s32.totalorder %s266_s24, 0 }
 0x1b2   :  { %270 = shalt.err (%p346_p7)  }
 0x1b3   :  { %272 = vsyncmov [#allocation4 + $0x4] }
 0x1b6   :  { %s273_s30 = vpop.sfrf %272 }
 0x1b7   :  { %p347_p8 = scmp.ne.s32.totalorder %s273_s30, 0 }
 0x1b9   :  { %277 = shalt.err (%p347_p8)  }
 0x1ba   :  { %279 = vsyncmov [#allocation4 + $0x5] }
 0x1bd   :  { %s280_s2 = vpop.sfrf %279 }
 0x1be   :  { %p348_p9 = scmp.ne.s32.totalorder %s280_s2, 0 }
 0x1c0   :  { %284 = shalt.err (%p348_p9)  }
 0x1c1   :  { %286 = vsyncmov [#allocation4 + $0x6] }
 0x1c4   :  { %s287_s3 = vpop.sfrf %286 }
 0x1c5   :  { %p349_p10 = scmp.ne.s32.totalorder %s287_s3, 0 }
 0x1c7   :  { %291 = shalt.err (%p349_p10)  }
 0x1c8   :  { %293 = vsyncmov [#allocation4 + $0x7] }
 0x1cb   :  { %s294_s4 = vpop.sfrf %293 }
 0x1cc   :  { %p350_p11 = scmp.ne.s32.totalorder %s294_s4, 0 }
 0x1ce   :  { %298 = shalt.err (%p350_p11)  }

</bundles_post_ra>
